<compile_context>
chip_gen: v5e
topology: v5e:2x2
jax: 0.10.0
libtpu: 0.0.40
codegen_flags: <defaults>
</compile_context>

<pallas_src>
import functools

import jax
import jax.numpy as jnp
from jax.experimental import pallas as pl
from jax.experimental.pallas import tpu as pltpu


# ----------------------------- Pallas kernel -------------------------------

def _conv1x1_bias_kernel(x_ref, w_ref, b_ref, o_ref):
    # x: (TM, Cin) bf16   w: (Cin, Cout) bf16   b: (1, Cout) f32   o: (TM, Cout) f32
    y = jnp.dot(x_ref[...], w_ref[...], preferred_element_type=jnp.float32)
    o_ref[...] = y + b_ref[...]


def _conv1x1_bias(x2d, w2d, bias_row, *, tile_m):
    """(M, Cin) @ (Cin, Cout) + bias, M-tiled, bf16 MXU inputs, f32 epilogue."""
    m, cin = x2d.shape
    cout = w2d.shape[1]

    tm = max(8, (min(tile_m, m) // 8) * 8)      # sublane-aligned row tile
    m_pad = pl.cdiv(m, tm) * tm
    if m_pad != m:
        x2d = jnp.pad(x2d, ((0, m_pad - m), (0, 0)))

    out = pl.pallas_call(
        _conv1x1_bias_kernel,
        out_shape=jax.ShapeDtypeStruct((m_pad, cout), jnp.float32),
        grid_spec=pltpu.PrefetchScalarGridSpec(
            num_scalar_prefetch=0,
            grid=(m_pad // tm,),
            in_specs=[
                pl.BlockSpec((tm, cin), lambda i: (i, 0)),
                pl.BlockSpec((cin, cout), lambda i: (0, 0)),
                pl.BlockSpec((1, cout), lambda i: (0, 0)),
            ],
            out_specs=pl.BlockSpec((tm, cout), lambda i: (i, 0)),
        ),
        compiler_params=pltpu.CompilerParams(
            dimension_semantics=("parallel",),
            vmem_limit_bytes=32 * 1024 * 1024,
        ),
    )(x2d.astype(jnp.bfloat16), w2d.astype(jnp.bfloat16),
      bias_row.astype(jnp.float32))

    return out[:m]


# ------------------------------ public forward ------------------------------

def class_head_forward(x_nchw, weight, bias, num_anchors=3, tile_m=512):
    """ClassHead forward.  weight: (Cout, Cin, 1, 1), bias: (Cout,)."""
    n, cin, h, w = x_nchw.shape
    cout = weight.shape[0]                       # num_anchors * 2

    # NCHW -> NHWC slab of pixels (rows) x channels (lanes).
    x2d = jnp.transpose(x_nchw, (0, 2, 3, 1)).reshape(n * h * w, cin)
    w2d = jnp.transpose(weight.reshape(cout, cin), (1, 0))       # (Cin, Cout)

    out2d = _conv1x1_bias(x2d, w2d, bias.reshape(1, cout), tile_m=tile_m)

    # permute(0,2,3,1).view(N, -1, 2): rows are already in (n, h, w) order,
    # so this is a free reshape: (N*H*W, num_anchors*2) -> (N, H*W*A, 2).
    return out2d.reshape(n, h * w * num_anchors, 2)


# --------------------------- reference (pure JAX) ---------------------------

def class_head_ref(x_nchw, weight, bias, num_anchors=3):
    n, cin, h, w = x_nchw.shape
    cout = weight.shape[0]
    x_nhwc = jnp.transpose(x_nchw, (0, 2, 3, 1))
    y = jnp.einsum("nhwc,oc->nhwo", x_nhwc, weight.reshape(cout, cin),
                   preferred_element_type=jnp.float32) + bias
    return y.reshape(n, h * w * num_anchors, 2)


# --------------------------------- main --------------------------------------

if __name__ == "__main__":
    key = jax.random.PRNGKey(0)

    batch, inchannels, hh, ww = 2, 256, 16, 16   # module default inchannels=256
    num_anchors = 3
    cout = num_anchors * 2

    kx, kw, kb = jax.random.split(key, 3)
    x = jax.random.normal(kx, (batch, inchannels, hh, ww), jnp.float32)
    weight = 0.05 * jax.random.normal(kw, (cout, inchannels, 1, 1), jnp.float32)
    bias = 0.1 * jax.random.normal(kb, (cout,), jnp.float32)

    fwd = functools.partial(class_head_forward, num_anchors=num_anchors)
    out = jax.block_until_ready(fwd(x, weight, bias))
    ref = class_head_ref(x, weight, bias, num_anchors)

    assert out.shape == (batch, hh * ww * num_anchors, 2), out.shape
    max_err = float(jnp.max(jnp.abs(out - ref)))
    assert jnp.allclose(out, ref, atol=2e-2, rtol=2e-2), max_err

    print("KERNEL_OK")
</pallas_src>

<mosaic_0001>
module attributes {stable_mosaic.version = 11 : i64} {
  func.func @_conv1x1_bias_kernel(%arg0: i32, %arg1: memref<512x256xbf16, #tpu.memory_space<vmem>>, %arg2: memref<256x6xbf16, #tpu.memory_space<vmem>>, %arg3: memref<1x6xf32, #tpu.memory_space<vmem>>, %arg4: memref<512x6xf32, #tpu.memory_space<vmem>>) attributes {dimension_semantics = [#tpu.dimension_semantics<parallel>], iteration_bounds = array<i64: 1>, scalar_prefetch = 0 : i64, scratch_operands = 0 : i64, tpu.core_type = #tpu.core_type<tc>, window_params = [{transform_indices = @transform_0, window_bounds = array<i64: 512, 256>}, {pipeline_mode = #tpu.pipeline_mode<synchronous>, transform_indices = @transform_1, window_bounds = array<i64: 256, 6>}, {pipeline_mode = #tpu.pipeline_mode<synchronous>, transform_indices = @transform_2, window_bounds = array<i64: 1, 6>}, {transform_indices = @transform_3, window_bounds = array<i64: 512, 6>}]} {
    %c0 = arith.constant 0 : index
    %c0_0 = arith.constant 0 : index
    %0 = vector.load %arg1[%c0, %c0_0] : memref<512x256xbf16, #tpu.memory_space<vmem>>, vector<512x256xbf16>
    %c0_1 = arith.constant 0 : index
    %c0_2 = arith.constant 0 : index
    %1 = vector.load %arg2[%c0_1, %c0_2] : memref<256x6xbf16, #tpu.memory_space<vmem>>, vector<256x6xbf16>
    %cst = arith.constant dense<0.000000e+00> : vector<512x6xf32>
    %2 = tpu.matmul %0, %1, %cst {dimension_numbers = #tpu.dot_dimension_numbers<[1], [0], [0], [1], [0, 0, 1, 1], [], []>} : vector<512x256xbf16>, vector<256x6xbf16>, vector<512x6xf32> -> vector<512x6xf32>
    %c0_3 = arith.constant 0 : index
    %c0_4 = arith.constant 0 : index
    %3 = vector.load %arg3[%c0_3, %c0_4] : memref<1x6xf32, #tpu.memory_space<vmem>>, vector<1x6xf32>
    %4 = vector.broadcast %3 : vector<1x6xf32> to vector<512x6xf32>
    %5 = arith.addf %2, %4 : vector<512x6xf32>
    %c0_5 = arith.constant 0 : index
    %c0_6 = arith.constant 0 : index
    %6 = vector.load %arg4[%c0_5, %c0_6] : memref<512x6xf32, #tpu.memory_space<vmem>>, vector<512x6xf32>
    tpu.vector_store %arg4[%c0_5, %c0_6], %5 {strides = array<i32>} : memref<512x6xf32, #tpu.memory_space<vmem>>, vector<512x6xf32>,
    return
  }
  func.func @transform_0(%arg0: i32) -> (i32, i32) {
    %c0_i32 = arith.constant 0 : i32
    %c0_i32_0 = arith.constant 0 : i32
    return %arg0, %c0_i32 : i32, i32
  }
  func.func @transform_1(%arg0: i32) -> (i32, i32) {
    %c0_i32 = arith.constant 0 : i32
    %c0_i32_0 = arith.constant 0 : i32
    %c0_i32_1 = arith.constant 0 : i32
    return %c0_i32, %c0_i32_0 : i32, i32
  }
  func.func @transform_2(%arg0: i32) -> (i32, i32) {
    %c0_i32 = arith.constant 0 : i32
    %c0_i32_0 = arith.constant 0 : i32
    %c0_i32_1 = arith.constant 0 : i32
    return %c0_i32, %c0_i32_0 : i32, i32
  }
  func.func @transform_3(%arg0: i32) -> (i32, i32) {
    %c0_i32 = arith.constant 0 : i32
    %c0_i32_0 = arith.constant 0 : i32
    return %arg0, %c0_i32 : i32, i32
  }
}

</mosaic_0001>

<bundles_post_ra>
// kernel: tpu_custom_call.1
= control target key start
LH: loop header
LB: loop body
LE: loop exit
PB: predicated region body
PF: predicated region fallthrough
CT: control target
= control target key end

     0   :  { %8 = vsyncpa [#allocation3], 0  ;;  %s1400_s15 = smov [#allocation2]   ;;  %s1401_s17 = smov 128   ;;  %s1799_s0 = inlined_call_operand.hbm [shape: bf16[512,256], index: 0, kind: input, shape index: {}]   ;;  %s1800_s1 = inlined_call_operand.vmem [shape: bf16[256,6], index: 1, kind: input, shape index: {}]   ;;  %s1801_s2 = inlined_call_operand.vmem [shape: f32[1,6], index: 2, kind: input, shape index: {}]   ;;  %s1802_s3 = inlined_call_operand.vmem [shape: f32[512,6], index: 3, kind: output, shape index: {}]  }
   0x1   :  { %s13_s14 = sshll.u32 %s1799_s0, 4  ;;  %s15_s16 = sshll.u32 %s1400_s15, 4  ;;  %s14_s14 = int_to_ptr.hbm [resolvable:$true] %s13_s14  ;;  %s16_s16 = int_to_ptr.vmem [resolvable:$true] %s15_s16 }
   0x2   :  { %s1402_s18 = smov 8  }
   0x3   :  { %21 = dma.hbm_to_vmem [thread:$0]  %s14_s14, 8192, %s16_s16, [#allocation3], %s1401_s17, %s1401_s17, %s1402_s18  }
   0x4   :  { %1398 = dma.done.wait [#allocation3], 8192  }
   0x5   :  { %1399 = vsyncadd [#allocation3], 4294959104  ;;  %v1345_v0 = vld [vmem:[%s1800_s1 + $0x38] sm:$0xff]  ;;  %v1344_v2 = vld [vmem:[%s1800_s1 + $0x30] sm:$0xff]  ;;  %vm884_vm0 = vcmask 48128  }
   0x6   :  { %v1353_v1 = vld [vmem:[%s1800_s1 + $0x78] sm:$0xff]  ;;  %546 = vmatpush.bf16.msra.mxu0 %v1345_v0  ;;  %1354 = vmatpush.bf16.msra.mxu2 %v1345_v0  ;;  %v1352_v3 = vld [vmem:[%s1800_s1 + $0x70] sm:$0xff]  ;;  %v1343_v4 = vld [vmem:[%s1800_s1 + $0x28] sm:$0xff] }
   0x7   :  { %715 = vmatpush.bf16.msra.mxu1 %v1353_v1  ;;  %1362 = vmatpush.bf16.msra.mxu3 %v1353_v1  ;;  %v1351_v5 = vld [vmem:[%s1800_s1 + $0x68] sm:$0xff]  ;;  %v1342_v6 = vld [vmem:[%s1800_s1 + $0x20] sm:$0xff]  ;;  %v1341_v8 = vld [vmem:[%s1800_s1 + $0x18] sm:$0xff] }
   0x8   :  { %v1350_v7 = vld [vmem:[%s1800_s1 + $0x60] sm:$0xff]  ;;  %v1349_v9 = vld [vmem:[%s1800_s1 + $0x58] sm:$0xff]  ;;  %v1340_v10 = vld [vmem:[%s1800_s1 + $0x10] sm:$0xff] }
   0x9   :  { %v1348_v11 = vld [vmem:[%s1800_s1 + $0x50] sm:$0xff]  ;;  %v1339_v12 = vld [vmem:[%s1800_s1 + $0x8] sm:$0xff]  ;;  %v1338_v14 = vld [vmem:[%s1800_s1] sm:$0xff] }
   0xa   :  { %547 = vmatpush.bf16.msra.mxu0 %v1344_v2  ;;  %1355 = vmatpush.bf16.msra.mxu2 %v1344_v2  ;;  %v1347_v13 = vld [vmem:[%s1800_s1 + $0x48] sm:$0xff]  ;;  %v1346_v15 = vld [vmem:[%s1800_s1 + $0x40] sm:$0xff]  ;;  %v964_v28 = vld [vmem:[#allocation2 + $0x10] sm:$0xf] }
   0xb   :  { %716 = vmatpush.bf16.msra.mxu1 %v1352_v3  ;;  %1363 = vmatpush.bf16.msra.mxu3 %v1352_v3  ;;  %v956_v16 = vld [vmem:[#allocation2] sm:$0xf]  ;;  %v1275_v17 = vld [vmem:[#allocation2 + $0x4] sm:$0xf0]  ;;  %v1274_v20 = vld [vmem:[#allocation2 + $0x4] sm:$0xf] }
   0xc   :  { %v1084_v18 = vld [vmem:[#allocation2 + $0x100] sm:$0xf]  ;;  %v1307_v19 = vld [vmem:[#allocation2 + $0x104] sm:$0xf0]  ;;  %v958_v21 = vld [vmem:[#allocation2 + $0x8] sm:$0xf0]  ;;  %v957_v24 = vor.u32 %v1275_v17, %v956_v16 }
   0xd   :  { %v1306_v22 = vld [vmem:[#allocation2 + $0x104] sm:$0xf]  ;;  %v1086_v23 = vld [vmem:[#allocation2 + $0x108] sm:$0xf0]  ;;  %v1085_v25 = vor.u32 %v1307_v19, %v1084_v18  ;;  %v961_v26 = vor.u32 %v1274_v20, %v958_v21  ;;  %v1277_v29 = vld [vmem:[#allocation2 + $0x14] sm:$0xf0] }
   0xe   :  { %548 = vmatpush.bf16.msra.mxu0 %v1343_v4  ;;  %1356 = vmatpush.bf16.msra.mxu2 %v1343_v4  ;;  %v1089_v27 = vor.u32 %v1306_v22, %v1086_v23  ;;  %v1092_v30 = vld [vmem:[#allocation2 + $0x110] sm:$0xf]  ;;  %v1309_v31 = vld [vmem:[#allocation2 + $0x114] sm:$0xf0]  ;;  %v1276_v32 = vld [vmem:[#allocation2 + $0x14] sm:$0xf]  ;;  %v965_v36 = vor.u32 %v1277_v29, %v964_v28 }
   0xf   :  { %717 = vmatpush.bf16.msra.mxu1 %v1351_v5  ;;  %1364 = vmatpush.bf16.msra.mxu3 %v1351_v5  ;;  %v966_v33 = vld [vmem:[#allocation2 + $0x18] sm:$0xf0]  ;;  %v1308_v34 = vld [vmem:[#allocation2 + $0x114] sm:$0xf]  ;;  %v1093_v37 = vor.u32 %v1309_v31, %v1092_v30  ;;  %v972_v40 = vld [vmem:[#allocation2 + $0x20] sm:$0xf] }
  0x10   :  { %v1094_v35 = vld [vmem:[#allocation2 + $0x118] sm:$0xf0]  ;;  %v969_v38 = vor.u32 %v1276_v32, %v966_v33  ;;  %v1279_v41 = vld [vmem:[#allocation2 + $0x24] sm:$0xf0]  ;;  %v1100_v42 = vld [vmem:[#allocation2 + $0x120] sm:$0xf] }
  0x11   :  { %v1097_v39 = vor.u32 %v1308_v34, %v1094_v35  ;;  %v1311_v43 = vld [vmem:[#allocation2 + $0x124] sm:$0xf0]  ;;  %v1278_v44 = vld [vmem:[#allocation2 + $0x24] sm:$0xf]  ;;  %v974_v45 = vld [vmem:[#allocation2 + $0x28] sm:$0xf0]  ;;  %v973_v48 = vor.u32 %v1279_v41, %v972_v40 }
  0x12   :  { %549 = vmatpush.bf16.msra.mxu0 %v1342_v6  ;;  %1357 = vmatpush.bf16.msra.mxu2 %v1342_v6  ;;  %v1310_v46 = vld [vmem:[#allocation2 + $0x124] sm:$0xf]  ;;  %v1102_v47 = vld [vmem:[#allocation2 + $0x128] sm:$0xf0]  ;;  %v1101_v49 = vor.u32 %v1311_v43, %v1100_v42  ;;  %v977_v50 = vor.u32 %v1278_v44, %v974_v45  ;;  %v980_v52 = vld [vmem:[#allocation2 + $0x30] sm:$0xf] }
  0x13   :  { %718 = vmatpush.bf16.msra.mxu1 %v1350_v7  ;;  %1365 = vmatpush.bf16.msra.mxu3 %v1350_v7  ;;  %v1105_v51 = vor.u32 %v1310_v46, %v1102_v47  ;;  %v1281_v53 = vld [vmem:[#allocation2 + $0x34] sm:$0xf0]  ;;  %v1108_v54 = vld [vmem:[#allocation2 + $0x130] sm:$0xf]  ;;  %v1280_v56 = vld [vmem:[#allocation2 + $0x34] sm:$0xf] }
  0x14   :  { %v1313_v55 = vld [vmem:[#allocation2 + $0x134] sm:$0xf0]  ;;  %v982_v57 = vld [vmem:[#allocation2 + $0x38] sm:$0xf0]  ;;  %v1312_v58 = vld [vmem:[#allocation2 + $0x134] sm:$0xf]  ;;  %v981_v60 = vor.u32 %v1281_v53, %v980_v52 }
  0x15   :  { %v1110_v59 = vld [vmem:[#allocation2 + $0x138] sm:$0xf0]  ;;  %v1109_v61 = vor.u32 %v1313_v55, %v1108_v54  ;;  %v985_v62 = vor.u32 %v1280_v56, %v982_v57  ;;  %v988_v0 = vld [vmem:[#allocation2 + $0x40] sm:$0xf]  ;;  %v1283_v1 = vld [vmem:[#allocation2 + $0x44] sm:$0xf0] }
  0x16   :  { %550 = vmatpush.bf16.msra.mxu0 %v1341_v8  ;;  %1358 = vmatpush.bf16.msra.mxu2 %v1341_v8  ;;  %v1113_v63 = vor.u32 %v1312_v58, %v1110_v59  ;;  %v1116_v2 = vld [vmem:[#allocation2 + $0x140] sm:$0xf]  ;;  %v1315_v3 = vld [vmem:[#allocation2 + $0x144] sm:$0xf0]  ;;  %v1282_v4 = vld [vmem:[#allocation2 + $0x44] sm:$0xf]  ;;  %v989_v8 = vor.u32 %v1283_v1, %v988_v0 }
  0x17   :  { %719 = vmatpush.bf16.msra.mxu1 %v1349_v9  ;;  %1366 = vmatpush.bf16.msra.mxu3 %v1349_v9  ;;  %v990_v5 = vld [vmem:[#allocation2 + $0x48] sm:$0xf0]  ;;  %v1314_v6 = vld [vmem:[#allocation2 + $0x144] sm:$0xf]  ;;  %v1117_v9 = vor.u32 %v1315_v3, %v1116_v2  ;;  %v1284_v16 = vld [vmem:[#allocation2 + $0x54] sm:$0xf] }
  0x18   :  { %v1118_v7 = vld [vmem:[#allocation2 + $0x148] sm:$0xf0]  ;;  %v998_v17 = vld [vmem:[#allocation2 + $0x58] sm:$0xf0]  ;;  %v1316_v18 = vld [vmem:[#allocation2 + $0x154] sm:$0xf] }
  0x19   :  { %v1126_v19 = vld [vmem:[#allocation2 + $0x158] sm:$0xf0]  ;;  %v1001_v22 = vor.u32 %v1284_v16, %v998_v17  ;;  %v1286_v28 = vld [vmem:[#allocation2 + $0x64] sm:$0xf]  ;;  %v1006_v29 = vld [vmem:[#allocation2 + $0x68] sm:$0xf0] }
  0x1a   :  { %551 = vmatpush.bf16.msra.mxu0 %v1340_v10  ;;  %1359 = vmatpush.bf16.msra.mxu2 %v1340_v10  ;;  %v993_v10 = vor.u32 %v1282_v4, %v990_v5  ;;  %v1129_v23 = vor.u32 %v1316_v18, %v1126_v19  ;;  %v1318_v30 = vld [vmem:[#allocation2 + $0x164] sm:$0xf]  ;;  %v1134_v31 = vld [vmem:[#allocation2 + $0x168] sm:$0xf0]  ;;  %v1009_v34 = vor.u32 %v1286_v28, %v1006_v29  ;;  %v1288_v40 = vld [vmem:[#allocation2 + $0x74] sm:$0xf] }
  0x1b   :  { %720 = vmatpush.bf16.msra.mxu1 %v1348_v11  ;;  %1367 = vmatpush.bf16.msra.mxu3 %v1348_v11  ;;  %v1121_v11 = vor.u32 %v1314_v6, %v1118_v7  ;;  %v1137_v35 = vor.u32 %v1318_v30, %v1134_v31  ;;  %v1014_v41 = vld [vmem:[#allocation2 + $0x78] sm:$0xf0]  ;;  %v1320_v42 = vld [vmem:[#allocation2 + $0x174] sm:$0xf]  ;;  %v1323_v52 = vld [vmem:[#allocation2 + $0x184] sm:$0xf0] }
  0x1c   :  { %v1142_v43 = vld [vmem:[#allocation2 + $0x178] sm:$0xf0]  ;;  %v1017_v46 = vor.u32 %v1288_v40, %v1014_v41  ;;  %v1290_v53 = vld [vmem:[#allocation2 + $0x84] sm:$0xf]  ;;  %v1022_v54 = vld [vmem:[#allocation2 + $0x88] sm:$0xf0] }
  0x1d   :  { %v1145_v47 = vor.u32 %v1320_v42, %v1142_v43  ;;  %v1322_v55 = vld [vmem:[#allocation2 + $0x184] sm:$0xf]  ;;  %v1150_v56 = vld [vmem:[#allocation2 + $0x188] sm:$0xf0]  ;;  %v1158_v16 = vld [vmem:[#allocation2 + $0x198] sm:$0xf0] }
  0x1e   :  { %552 = vmatpush.bf16.msra.mxu0 %v1339_v12  ;;  %1360 = vmatpush.bf16.msra.mxu2 %v1339_v12  ;;  %v996_v12 = vld [vmem:[#allocation2 + $0x50] sm:$0xf]  ;;  %v1327_v40 = vld [vmem:[#allocation2 + $0x1a4] sm:$0xf0]  ;;  %v1294_v41 = vld [vmem:[#allocation2 + $0xa4] sm:$0xf] }
  0x1f   :  { %721 = vmatpush.bf16.msra.mxu1 %v1347_v13  ;;  %1368 = vmatpush.bf16.msra.mxu3 %v1347_v13  ;;  %v1285_v13 = vld [vmem:[#allocation2 + $0x54] sm:$0xf0]  ;;  %v1038_v42 = vld [vmem:[#allocation2 + $0xa8] sm:$0xf0]  ;;  %v1326_v43 = vld [vmem:[#allocation2 + $0x1a4] sm:$0xf] }
  0x20   :  { %v997_v20 = vor.u32 %v1285_v13, %v996_v12  ;;  %v1325_v12 = vld [vmem:[#allocation2 + $0x194] sm:$0xf0]  ;;  %v1292_v13 = vld [vmem:[#allocation2 + $0x94] sm:$0xf] }
  0x22   :  { %553 = vmatpush.bf16.msra.mxu0 %v1338_v14  ;;  %1361 = vmatpush.bf16.msra.mxu2 %v1338_v14  ;;  %v1124_v14 = vld [vmem:[#allocation2 + $0x150] sm:$0xf] }
  0x23   :  { %722 = vmatpush.bf16.msra.mxu1 %v1346_v15  ;;  %1369 = vmatpush.bf16.msra.mxu3 %v1346_v15  ;;  %v1317_v15 = vld [vmem:[#allocation2 + $0x154] sm:$0xf0] }
  0x24   :  { %v1125_v21 = vor.u32 %v1317_v15, %v1124_v14  ;;  %v1030_v14 = vld [vmem:[#allocation2 + $0x98] sm:$0xf0]  ;;  %v1324_v15 = vld [vmem:[#allocation2 + $0x194] sm:$0xf] }
  0x25   :  { %554 = vmatmul.bf16.vlgmr.msra.gmra.mxu0 %v957_v24  ;;  %634 = vmatmul.bf16.vlgmr.msra.gmra.mxu2 %v1085_v25  ;;  %v1004_v24 = vld [vmem:[#allocation2 + $0x60] sm:$0xf]  ;;  %v1287_v25 = vld [vmem:[#allocation2 + $0x64] sm:$0xf0] }
  0x26   :  { %723 = vmatmul.bf16.vlgmr.msra.gmra.mxu1 %v961_v26  ;;  %803 = vmatmul.bf16.vlgmr.msra.gmra.mxu3 %v1089_v27  ;;  %v1132_v26 = vld [vmem:[#allocation2 + $0x160] sm:$0xf]  ;;  %v1319_v27 = vld [vmem:[#allocation2 + $0x164] sm:$0xf0]  ;;  %v1005_v32 = vor.u32 %v1287_v25, %v1004_v24  ;;  %v1161_v24 = vor.u32 %v1324_v15, %v1158_v16 }
  0x27   :  { %v1133_v33 = vor.u32 %v1319_v27, %v1132_v26 }
  0x35   :  { %559 = vmatmul.bf16.gmra.mxu0 %v965_v36  ;;  %639 = vmatmul.bf16.gmra.mxu2 %v1093_v37  ;;  %v1012_v36 = vld [vmem:[#allocation2 + $0x70] sm:$0xf]  ;;  %v1289_v37 = vld [vmem:[#allocation2 + $0x74] sm:$0xf0] }
  0x36   :  { %728 = vmatmul.bf16.gmra.mxu1 %v969_v38  ;;  %808 = vmatmul.bf16.gmra.mxu3 %v1097_v39  ;;  %v1140_v38 = vld [vmem:[#allocation2 + $0x170] sm:$0xf]  ;;  %v1321_v39 = vld [vmem:[#allocation2 + $0x174] sm:$0xf0]  ;;  %v1013_v44 = vor.u32 %v1289_v37, %v1012_v36  ;;  %v1036_v36 = vld [vmem:[#allocation2 + $0xa0] sm:$0xf] }
  0x37   :  { %v1141_v45 = vor.u32 %v1321_v39, %v1140_v38  ;;  %v1295_v38 = vld [vmem:[#allocation2 + $0xa4] sm:$0xf0]  ;;  %v1164_v39 = vld [vmem:[#allocation2 + $0x1a0] sm:$0xf] }
  0x45   :  { %564 = vmatmul.bf16.gmra.mxu0 %v973_v48  ;;  %644 = vmatmul.bf16.gmra.mxu2 %v1101_v49  ;;  %v1477_v48 = vld [vmem:[%s1801_s2] ss:$0 sm:$0xff] }
  0x46   :  { %733 = vmatmul.bf16.gmra.mxu1 %v977_v50  ;;  %813 = vmatmul.bf16.gmra.mxu3 %v1105_v51  ;;  %v1020_v49 = vld [vmem:[#allocation2 + $0x80] sm:$0xf]  ;;  %v1291_v50 = vld [vmem:[#allocation2 + $0x84] sm:$0xf0] }
  0x47   :  { %v1148_v51 = vld [vmem:[#allocation2 + $0x180] sm:$0xf]  ;;  %v1021_v57 = vor.u32 %v1291_v50, %v1020_v49  ;;  %v1037_v49 = vor.u32 %v1295_v38, %v1036_v36  ;;  %v1165_v50 = vor.u32 %v1327_v40, %v1164_v39  ;;  %v1330_v36 = vld [vmem:[#allocation2 + $0x1c4] sm:$0xf] }
  0x48   :  { %v1149_v58 = vor.u32 %v1323_v52, %v1148_v51  ;;  %v1041_v52 = vor.u32 %v1294_v41, %v1038_v42 }
  0x55   :  { %569 = vmatmul.bf16.gmra.mxu0 %v981_v60  ;;  %649 = vmatmul.bf16.gmra.mxu2 %v1109_v61  ;;  %v1025_v60 = vor.u32 %v1290_v53, %v1022_v54  ;;  %v1153_v61 = vor.u32 %v1322_v55, %v1150_v56 }
  0x56   :  { %738 = vmatmul.bf16.gmra.mxu1 %v985_v62  ;;  %818 = vmatmul.bf16.gmra.mxu3 %v1113_v63 }
  0x65   :  { %574 = vmatmul.bf16.gmra.mxu0 %v989_v8  ;;  %654 = vmatmul.bf16.gmra.mxu2 %v1117_v9  ;;  %v1028_v8 = vld [vmem:[#allocation2 + $0x90] sm:$0xf] }
  0x66   :  { %743 = vmatmul.bf16.gmra.mxu1 %v993_v10  ;;  %823 = vmatmul.bf16.gmra.mxu3 %v1121_v11  ;;  %v1293_v10 = vld [vmem:[#allocation2 + $0x94] sm:$0xf0]  ;;  %v1156_v11 = vld [vmem:[#allocation2 + $0x190] sm:$0xf] }
  0x75   :  { %579 = vmatmul.bf16.gmra.mxu0 %v997_v20  ;;  %659 = vmatmul.bf16.gmra.mxu2 %v1125_v21  ;;  %v1029_v20 = vor.u32 %v1293_v10, %v1028_v8  ;;  %v1157_v21 = vor.u32 %v1325_v12, %v1156_v11  ;;  %v1328_v8 = vld [vmem:[#allocation2 + $0x1b4] sm:$0xf] }
  0x76   :  { %748 = vmatmul.bf16.gmra.mxu1 %v1001_v22  ;;  %828 = vmatmul.bf16.gmra.mxu3 %v1129_v23  ;;  %v1033_v23 = vor.u32 %v1292_v13, %v1030_v14 }
  0x85   :  { %584 = vmatmul.bf16.gmra.mxu0 %v1005_v32  ;;  %664 = vmatmul.bf16.gmra.mxu2 %v1133_v33 }
  0x86   :  { %753 = vmatmul.bf16.gmra.mxu1 %v1009_v34  ;;  %833 = vmatmul.bf16.gmra.mxu3 %v1137_v35 }
  0x95   :  { %589 = vmatmul.bf16.gmra.mxu0 %v1013_v44  ;;  %669 = vmatmul.bf16.gmra.mxu2 %v1141_v45  ;;  %v1166_v44 = vld [vmem:[#allocation2 + $0x1a8] sm:$0xf0] }
  0x96   :  { %758 = vmatmul.bf16.gmra.mxu1 %v1017_v46  ;;  %838 = vmatmul.bf16.gmra.mxu3 %v1145_v47  ;;  %v1169_v53 = vor.u32 %v1326_v43, %v1166_v44 }
  0xa2   :  { %v555_v59 = vpop.f32.mrf.mxu0 }
  0xa3   :  { %v556_v62 = vadd.f32 %v1477_v48, %v555_v59  ;;  %v724_v63 = vpop.f32.mrf.mxu1 }
  0xa5   :  { %v725_v0 = vadd.f32 %v724_v63, %v556_v62  ;;  %594 = vmatmul.bf16.gmra.mxu0 %v1021_v57  ;;  %674 = vmatmul.bf16.gmra.mxu2 %v1149_v58 }
  0xa6   :  { %763 = vmatmul.bf16.gmra.mxu1 %v1025_v60  ;;  %843 = vmatmul.bf16.gmra.mxu3 %v1153_v61 }
  0xa7   :  { %885 = vst.msk [vmem:[%s1802_s3] sm:$0xff] %vm884_vm0, %v725_v0 }
  0xa8   :  { %v635_v1 = vpop.f32.mrf.mxu2 }
  0xa9   :  { %v636_v2 = vadd.f32 %v1477_v48, %v635_v1  ;;  %v804_v3 = vpop.f32.mrf.mxu3  ;;  %v1044_v1 = vld [vmem:[#allocation2 + $0xb0] sm:$0xf] }
  0xaa   :  { %v557_v4 = vpop.f32.mrf.mxu0 }
  0xab   :  { %v805_v5 = vadd.f32 %v804_v3, %v636_v2  ;;  %v558_v6 = vadd.f32 %v1477_v48, %v557_v4  ;;  %v726_v7 = vpop.f32.mrf.mxu1  ;;  %v1297_v3 = vld [vmem:[#allocation2 + $0xb4] sm:$0xf0]  ;;  %v1172_v4 = vld [vmem:[#allocation2 + $0x1b0] sm:$0xf] }
  0xac   :  { %v1045_v13 = vor.u32 %v1297_v3, %v1044_v1  ;;  %v1332_v1 = vld [vmem:[#allocation2 + $0x1d4] sm:$0xf] }
  0xad   :  { %917 = vst.msk [vmem:[%s1802_s3 + $0x100] sm:$0xff] %vm884_vm0, %v805_v5  ;;  %v727_v9 = vadd.f32 %v726_v7, %v558_v6  ;;  %v1329_v5 = vld [vmem:[#allocation2 + $0x1b4] sm:$0xf0]  ;;  %v1296_v6 = vld [vmem:[#allocation2 + $0xb4] sm:$0xf] }
  0xae   :  { %v1046_v7 = vld [vmem:[#allocation2 + $0xb8] sm:$0xf0]  ;;  %v1173_v14 = vor.u32 %v1329_v5, %v1172_v4 }
  0xaf   :  { %886 = vst.msk [vmem:[%s1802_s3 + $0x8] sm:$0xff] %vm884_vm0, %v727_v9  ;;  %v1174_v9 = vld [vmem:[#allocation2 + $0x1b8] sm:$0xf0]  ;;  %v1049_v16 = vor.u32 %v1296_v6, %v1046_v7 }
  0xb0   :  { %v637_v17 = vpop.f32.mrf.mxu2 }
  0xb1   :  { %v638_v18 = vadd.f32 %v1477_v48, %v637_v17  ;;  %v806_v19 = vpop.f32.mrf.mxu3  ;;  %v1177_v17 = vor.u32 %v1328_v8, %v1174_v9 }
  0xb2   :  { %v560_v22 = vpop.f32.mrf.mxu0 }
  0xb3   :  { %v807_v25 = vadd.f32 %v806_v19, %v638_v18  ;;  %v561_v26 = vadd.f32 %v1477_v48, %v560_v22  ;;  %v729_v27 = vpop.f32.mrf.mxu1 }
  0xb5   :  { %918 = vst.msk [vmem:[%s1802_s3 + $0x108] sm:$0xff] %vm884_vm0, %v807_v25  ;;  %v730_v28 = vadd.f32 %v729_v27, %v561_v26  ;;  %599 = vmatmul.bf16.gmra.mxu0 %v1029_v20  ;;  %679 = vmatmul.bf16.gmra.mxu2 %v1157_v21 }
  0xb6   :  { %768 = vmatmul.bf16.gmra.mxu1 %v1033_v23  ;;  %848 = vmatmul.bf16.gmra.mxu3 %v1161_v24 }
  0xb7   :  { %887 = vst.msk [vmem:[%s1802_s3 + $0x10] sm:$0xff] %vm884_vm0, %v730_v28 }
  0xb8   :  { %v640_v29 = vpop.f32.mrf.mxu2 }
  0xb9   :  { %v641_v30 = vadd.f32 %v1477_v48, %v640_v29  ;;  %v809_v31 = vpop.f32.mrf.mxu3  ;;  %v1052_v29 = vld [vmem:[#allocation2 + $0xc0] sm:$0xf] }
  0xba   :  { %v562_v32 = vpop.f32.mrf.mxu0 }
  0xbb   :  { %v810_v33 = vadd.f32 %v809_v31, %v641_v30  ;;  %v563_v34 = vadd.f32 %v1477_v48, %v562_v32  ;;  %v731_v35 = vpop.f32.mrf.mxu1  ;;  %v1299_v31 = vld [vmem:[#allocation2 + $0xc4] sm:$0xf0]  ;;  %v1180_v32 = vld [vmem:[#allocation2 + $0x1c0] sm:$0xf] }
  0xbc   :  { %v1053_v41 = vor.u32 %v1299_v31, %v1052_v29  ;;  %v1334_v29 = vld [vmem:[#allocation2 + $0x1e4] sm:$0xf] }
  0xbd   :  { %919 = vst.msk [vmem:[%s1802_s3 + $0x110] sm:$0xff] %vm884_vm0, %v810_v33  ;;  %v732_v37 = vadd.f32 %v731_v35, %v563_v34  ;;  %v1331_v33 = vld [vmem:[#allocation2 + $0x1c4] sm:$0xf0]  ;;  %v1298_v34 = vld [vmem:[#allocation2 + $0xc4] sm:$0xf] }
  0xbe   :  { %v1054_v35 = vld [vmem:[#allocation2 + $0xc8] sm:$0xf0]  ;;  %v1181_v42 = vor.u32 %v1331_v33, %v1180_v32 }
  0xbf   :  { %888 = vst.msk [vmem:[%s1802_s3 + $0x18] sm:$0xff] %vm884_vm0, %v732_v37  ;;  %v1182_v37 = vld [vmem:[#allocation2 + $0x1c8] sm:$0xf0]  ;;  %v1057_v44 = vor.u32 %v1298_v34, %v1054_v35 }
  0xc0   :  { %v642_v45 = vpop.f32.mrf.mxu2 }
  0xc1   :  { %v643_v46 = vadd.f32 %v1477_v48, %v642_v45  ;;  %v811_v47 = vpop.f32.mrf.mxu3  ;;  %v1185_v45 = vor.u32 %v1330_v36, %v1182_v37 }
  0xc2   :  { %v565_v51 = vpop.f32.mrf.mxu0 }
  0xc3   :  { %v812_v54 = vadd.f32 %v811_v47, %v643_v46  ;;  %v566_v55 = vadd.f32 %v1477_v48, %v565_v51  ;;  %v734_v56 = vpop.f32.mrf.mxu1 }
  0xc5   :  { %920 = vst.msk [vmem:[%s1802_s3 + $0x118] sm:$0xff] %vm884_vm0, %v812_v54  ;;  %v735_v57 = vadd.f32 %v734_v56, %v566_v55  ;;  %604 = vmatmul.bf16.gmra.mxu0 %v1037_v49  ;;  %684 = vmatmul.bf16.gmra.mxu2 %v1165_v50 }
  0xc6   :  { %773 = vmatmul.bf16.gmra.mxu1 %v1041_v52  ;;  %853 = vmatmul.bf16.gmra.mxu3 %v1169_v53 }
  0xc7   :  { %889 = vst.msk [vmem:[%s1802_s3 + $0x20] sm:$0xff] %vm884_vm0, %v735_v57 }
  0xc8   :  { %v645_v58 = vpop.f32.mrf.mxu2 }
  0xc9   :  { %v646_v59 = vadd.f32 %v1477_v48, %v645_v58  ;;  %v814_v60 = vpop.f32.mrf.mxu3  ;;  %v1060_v58 = vld [vmem:[#allocation2 + $0xd0] sm:$0xf] }
  0xca   :  { %v567_v61 = vpop.f32.mrf.mxu0 }
  0xcb   :  { %v815_v62 = vadd.f32 %v814_v60, %v646_v59  ;;  %v568_v63 = vadd.f32 %v1477_v48, %v567_v61  ;;  %v736_v0 = vpop.f32.mrf.mxu1  ;;  %v1301_v60 = vld [vmem:[#allocation2 + $0xd4] sm:$0xf0]  ;;  %v1188_v61 = vld [vmem:[#allocation2 + $0x1d0] sm:$0xf] }
  0xcc   :  { %v1061_v6 = vor.u32 %v1301_v60, %v1060_v58  ;;  %v1336_v58 = vld [vmem:[#allocation2 + $0x1f4] sm:$0xf] }
  0xcd   :  { %921 = vst.msk [vmem:[%s1802_s3 + $0x120] sm:$0xff] %vm884_vm0, %v815_v62  ;;  %v737_v2 = vadd.f32 %v736_v0, %v568_v63  ;;  %v1333_v62 = vld [vmem:[#allocation2 + $0x1d4] sm:$0xf0]  ;;  %v1300_v63 = vld [vmem:[#allocation2 + $0xd4] sm:$0xf] }
  0xce   :  { %v1062_v0 = vld [vmem:[#allocation2 + $0xd8] sm:$0xf0]  ;;  %v1189_v7 = vor.u32 %v1333_v62, %v1188_v61 }
  0xcf   :  { %890 = vst.msk [vmem:[%s1802_s3 + $0x28] sm:$0xff] %vm884_vm0, %v737_v2  ;;  %v1190_v2 = vld [vmem:[#allocation2 + $0x1d8] sm:$0xf0]  ;;  %v1065_v9 = vor.u32 %v1300_v63, %v1062_v0 }
  0xd0   :  { %v647_v10 = vpop.f32.mrf.mxu2 }
  0xd1   :  { %v648_v11 = vadd.f32 %v1477_v48, %v647_v10  ;;  %v816_v12 = vpop.f32.mrf.mxu3  ;;  %v1193_v10 = vor.u32 %v1332_v1, %v1190_v2 }
  0xd2   :  { %v570_v15 = vpop.f32.mrf.mxu0 }
  0xd3   :  { %v817_v18 = vadd.f32 %v816_v12, %v648_v11  ;;  %v571_v19 = vadd.f32 %v1477_v48, %v570_v15  ;;  %v739_v20 = vpop.f32.mrf.mxu1 }
  0xd5   :  { %922 = vst.msk [vmem:[%s1802_s3 + $0x128] sm:$0xff] %vm884_vm0, %v817_v18  ;;  %v740_v21 = vadd.f32 %v739_v20, %v571_v19  ;;  %609 = vmatmul.bf16.gmra.mxu0 %v1045_v13  ;;  %689 = vmatmul.bf16.gmra.mxu2 %v1173_v14 }
  0xd6   :  { %778 = vmatmul.bf16.gmra.mxu1 %v1049_v16  ;;  %858 = vmatmul.bf16.gmra.mxu3 %v1177_v17 }
  0xd7   :  { %891 = vst.msk [vmem:[%s1802_s3 + $0x30] sm:$0xff] %vm884_vm0, %v740_v21 }
  0xd8   :  { %v650_v22 = vpop.f32.mrf.mxu2 }
  0xd9   :  { %v651_v23 = vadd.f32 %v1477_v48, %v650_v22  ;;  %v819_v24 = vpop.f32.mrf.mxu3  ;;  %v1068_v22 = vld [vmem:[#allocation2 + $0xe0] sm:$0xf] }
  0xda   :  { %v572_v25 = vpop.f32.mrf.mxu0 }
  0xdb   :  { %v820_v26 = vadd.f32 %v819_v24, %v651_v23  ;;  %v573_v27 = vadd.f32 %v1477_v48, %v572_v25  ;;  %v741_v28 = vpop.f32.mrf.mxu1  ;;  %v1303_v24 = vld [vmem:[#allocation2 + $0xe4] sm:$0xf0]  ;;  %v1196_v25 = vld [vmem:[#allocation2 + $0x1e0] sm:$0xf] }
  0xdc   :  { %v1069_v34 = vor.u32 %v1303_v24, %v1068_v22 }
  0xdd   :  { %923 = vst.msk [vmem:[%s1802_s3 + $0x130] sm:$0xff] %vm884_vm0, %v820_v26  ;;  %v742_v30 = vadd.f32 %v741_v28, %v573_v27  ;;  %v1335_v26 = vld [vmem:[#allocation2 + $0x1e4] sm:$0xf0]  ;;  %v1302_v27 = vld [vmem:[#allocation2 + $0xe4] sm:$0xf] }
  0xde   :  { %v1070_v28 = vld [vmem:[#allocation2 + $0xe8] sm:$0xf0]  ;;  %v1197_v35 = vor.u32 %v1335_v26, %v1196_v25 }
  0xdf   :  { %892 = vst.msk [vmem:[%s1802_s3 + $0x38] sm:$0xff] %vm884_vm0, %v742_v30  ;;  %v1198_v30 = vld [vmem:[#allocation2 + $0x1e8] sm:$0xf0]  ;;  %v1073_v37 = vor.u32 %v1302_v27, %v1070_v28 }
  0xe0   :  { %v652_v38 = vpop.f32.mrf.mxu2 }
  0xe1   :  { %v653_v39 = vadd.f32 %v1477_v48, %v652_v38  ;;  %v821_v40 = vpop.f32.mrf.mxu3  ;;  %v1201_v38 = vor.u32 %v1334_v29, %v1198_v30 }
  0xe2   :  { %v575_v43 = vpop.f32.mrf.mxu0 }
  0xe3   :  { %v822_v46 = vadd.f32 %v821_v40, %v653_v39  ;;  %v576_v47 = vadd.f32 %v1477_v48, %v575_v43  ;;  %v744_v49 = vpop.f32.mrf.mxu1 }
  0xe5   :  { %924 = vst.msk [vmem:[%s1802_s3 + $0x138] sm:$0xff] %vm884_vm0, %v822_v46  ;;  %v745_v50 = vadd.f32 %v744_v49, %v576_v47  ;;  %614 = vmatmul.bf16.gmra.mxu0 %v1053_v41  ;;  %694 = vmatmul.bf16.gmra.mxu2 %v1181_v42 }
  0xe6   :  { %783 = vmatmul.bf16.gmra.mxu1 %v1057_v44  ;;  %863 = vmatmul.bf16.gmra.mxu3 %v1185_v45 }
  0xe7   :  { %893 = vst.msk [vmem:[%s1802_s3 + $0x40] sm:$0xff] %vm884_vm0, %v745_v50 }
  0xe8   :  { %v655_v51 = vpop.f32.mrf.mxu2 }
  0xe9   :  { %v656_v52 = vadd.f32 %v1477_v48, %v655_v51  ;;  %v824_v53 = vpop.f32.mrf.mxu3  ;;  %v1076_v51 = vld [vmem:[#allocation2 + $0xf0] sm:$0xf] }
  0xea   :  { %v577_v54 = vpop.f32.mrf.mxu0 }
  0xeb   :  { %v825_v55 = vadd.f32 %v824_v53, %v656_v52  ;;  %v578_v56 = vadd.f32 %v1477_v48, %v577_v54  ;;  %v746_v57 = vpop.f32.mrf.mxu1  ;;  %v1305_v53 = vld [vmem:[#allocation2 + $0xf4] sm:$0xf0]  ;;  %v1204_v54 = vld [vmem:[#allocation2 + $0x1f0] sm:$0xf] }
  0xec   :  { %v1077_v63 = vor.u32 %v1305_v53, %v1076_v51 }
  0xed   :  { %925 = vst.msk [vmem:[%s1802_s3 + $0x140] sm:$0xff] %vm884_vm0, %v825_v55  ;;  %v747_v59 = vadd.f32 %v746_v57, %v578_v56  ;;  %v1337_v55 = vld [vmem:[#allocation2 + $0x1f4] sm:$0xf0]  ;;  %v1304_v56 = vld [vmem:[#allocation2 + $0xf4] sm:$0xf] }
  0xee   :  { %v1078_v57 = vld [vmem:[#allocation2 + $0xf8] sm:$0xf0]  ;;  %v1205_v0 = vor.u32 %v1337_v55, %v1204_v54 }
  0xef   :  { %894 = vst.msk [vmem:[%s1802_s3 + $0x48] sm:$0xff] %vm884_vm0, %v747_v59  ;;  %v1206_v59 = vld [vmem:[#allocation2 + $0x1f8] sm:$0xf0]  ;;  %v1081_v2 = vor.u32 %v1304_v56, %v1078_v57 }
  0xf0   :  { %v657_v3 = vpop.f32.mrf.mxu2 }
  0xf1   :  { %v658_v4 = vadd.f32 %v1477_v48, %v657_v3  ;;  %v826_v5 = vpop.f32.mrf.mxu3  ;;  %v1209_v3 = vor.u32 %v1336_v58, %v1206_v59 }
  0xf2   :  { %v580_v8 = vpop.f32.mrf.mxu0 }
  0xf3   :  { %v827_v11 = vadd.f32 %v826_v5, %v658_v4  ;;  %v581_v12 = vadd.f32 %v1477_v48, %v580_v8  ;;  %v749_v13 = vpop.f32.mrf.mxu1 }
  0xf5   :  { %926 = vst.msk [vmem:[%s1802_s3 + $0x148] sm:$0xff] %vm884_vm0, %v827_v11  ;;  %v750_v14 = vadd.f32 %v749_v13, %v581_v12  ;;  %619 = vmatmul.bf16.gmra.mxu0 %v1061_v6  ;;  %699 = vmatmul.bf16.gmra.mxu2 %v1189_v7 }
  0xf6   :  { %788 = vmatmul.bf16.gmra.mxu1 %v1065_v9  ;;  %868 = vmatmul.bf16.gmra.mxu3 %v1193_v10 }
  0xf7   :  { %895 = vst.msk [vmem:[%s1802_s3 + $0x50] sm:$0xff] %vm884_vm0, %v750_v14 }
  0xf8   :  { %v660_v15 = vpop.f32.mrf.mxu2 }
  0xf9   :  { %v661_v16 = vadd.f32 %v1477_v48, %v660_v15  ;;  %v829_v17 = vpop.f32.mrf.mxu3 }
  0xfa   :  { %v582_v18 = vpop.f32.mrf.mxu0 }
  0xfb   :  { %v830_v19 = vadd.f32 %v829_v17, %v661_v16  ;;  %v583_v20 = vadd.f32 %v1477_v48, %v582_v18  ;;  %v751_v21 = vpop.f32.mrf.mxu1 }
  0xfd   :  { %927 = vst.msk [vmem:[%s1802_s3 + $0x150] sm:$0xff] %vm884_vm0, %v830_v19  ;;  %v752_v23 = vadd.f32 %v751_v21, %v583_v20 }
  0xff   :  { %896 = vst.msk [vmem:[%s1802_s3 + $0x58] sm:$0xff] %vm884_vm0, %v752_v23 }
 0x100   :  { %v662_v31 = vpop.f32.mrf.mxu2 }
 0x101   :  { %v663_v32 = vadd.f32 %v1477_v48, %v662_v31  ;;  %v831_v33 = vpop.f32.mrf.mxu3 }
 0x102   :  { %v585_v36 = vpop.f32.mrf.mxu0 }
 0x103   :  { %v832_v39 = vadd.f32 %v831_v33, %v663_v32  ;;  %v586_v40 = vadd.f32 %v1477_v48, %v585_v36  ;;  %v754_v41 = vpop.f32.mrf.mxu1 }
 0x105   :  { %928 = vst.msk [vmem:[%s1802_s3 + $0x158] sm:$0xff] %vm884_vm0, %v832_v39  ;;  %v755_v42 = vadd.f32 %v754_v41, %v586_v40  ;;  %624 = vmatmul.bf16.gmra.mxu0 %v1069_v34  ;;  %704 = vmatmul.bf16.gmra.mxu2 %v1197_v35 }
 0x106   :  { %793 = vmatmul.bf16.gmra.mxu1 %v1073_v37  ;;  %873 = vmatmul.bf16.gmra.mxu3 %v1201_v38 }
 0x107   :  { %897 = vst.msk [vmem:[%s1802_s3 + $0x60] sm:$0xff] %vm884_vm0, %v755_v42 }
 0x108   :  { %v665_v43 = vpop.f32.mrf.mxu2 }
 0x109   :  { %v666_v44 = vadd.f32 %v1477_v48, %v665_v43  ;;  %v834_v45 = vpop.f32.mrf.mxu3 }
 0x10a   :  { %v587_v46 = vpop.f32.mrf.mxu0 }
 0x10b   :  { %v835_v47 = vadd.f32 %v834_v45, %v666_v44  ;;  %v588_v49 = vadd.f32 %v1477_v48, %v587_v46  ;;  %v756_v50 = vpop.f32.mrf.mxu1 }
 0x10d   :  { %929 = vst.msk [vmem:[%s1802_s3 + $0x160] sm:$0xff] %vm884_vm0, %v835_v47  ;;  %v757_v52 = vadd.f32 %v756_v50, %v588_v49 }
 0x10f   :  { %898 = vst.msk [vmem:[%s1802_s3 + $0x68] sm:$0xff] %vm884_vm0, %v757_v52 }
 0x110   :  { %v667_v60 = vpop.f32.mrf.mxu2 }
 0x111   :  { %v668_v61 = vadd.f32 %v1477_v48, %v667_v60  ;;  %v836_v62 = vpop.f32.mrf.mxu3 }
 0x112   :  { %v590_v1 = vpop.f32.mrf.mxu0 }
 0x113   :  { %v837_v4 = vadd.f32 %v836_v62, %v668_v61  ;;  %v591_v5 = vadd.f32 %v1477_v48, %v590_v1  ;;  %v759_v6 = vpop.f32.mrf.mxu1 }
 0x115   :  { %930 = vst.msk [vmem:[%s1802_s3 + $0x168] sm:$0xff] %vm884_vm0, %v837_v4  ;;  %v760_v7 = vadd.f32 %v759_v6, %v591_v5  ;;  %629 = vmatmul.bf16.gmra.mxu0 %v1077_v63  ;;  %709 = vmatmul.bf16.gmra.mxu2 %v1205_v0 }
 0x116   :  { %798 = vmatmul.bf16.gmra.mxu1 %v1081_v2  ;;  %878 = vmatmul.bf16.gmra.mxu3 %v1209_v3 }
 0x117   :  { %899 = vst.msk [vmem:[%s1802_s3 + $0x70] sm:$0xff] %vm884_vm0, %v760_v7 }
 0x118   :  { %v670_v8 = vpop.f32.mrf.mxu2 }
 0x119   :  { %v671_v9 = vadd.f32 %v1477_v48, %v670_v8  ;;  %v839_v10 = vpop.f32.mrf.mxu3 }
 0x11a   :  { %v592_v11 = vpop.f32.mrf.mxu0 }
 0x11b   :  { %v840_v12 = vadd.f32 %v839_v10, %v671_v9  ;;  %v593_v13 = vadd.f32 %v1477_v48, %v592_v11  ;;  %v761_v14 = vpop.f32.mrf.mxu1 }
 0x11d   :  { %931 = vst.msk [vmem:[%s1802_s3 + $0x170] sm:$0xff] %vm884_vm0, %v840_v12  ;;  %v762_v15 = vadd.f32 %v761_v14, %v593_v13 }
 0x11f   :  { %900 = vst.msk [vmem:[%s1802_s3 + $0x78] sm:$0xff] %vm884_vm0, %v762_v15 }
 0x120   :  { %v672_v16 = vpop.f32.mrf.mxu2 }
 0x121   :  { %v673_v17 = vadd.f32 %v1477_v48, %v672_v16  ;;  %v841_v18 = vpop.f32.mrf.mxu3 }
 0x122   :  { %v595_v19 = vpop.f32.mrf.mxu0 }
 0x123   :  { %v842_v20 = vadd.f32 %v841_v18, %v673_v17  ;;  %v596_v21 = vadd.f32 %v1477_v48, %v595_v19  ;;  %v764_v22 = vpop.f32.mrf.mxu1 }
 0x125   :  { %932 = vst.msk [vmem:[%s1802_s3 + $0x178] sm:$0xff] %vm884_vm0, %v842_v20  ;;  %v765_v23 = vadd.f32 %v764_v22, %v596_v21 }
 0x127   :  { %901 = vst.msk [vmem:[%s1802_s3 + $0x80] sm:$0xff] %vm884_vm0, %v765_v23 }
 0x128   :  { %v675_v24 = vpop.f32.mrf.mxu2 }
 0x129   :  { %v676_v25 = vadd.f32 %v1477_v48, %v675_v24  ;;  %v844_v26 = vpop.f32.mrf.mxu3 }
 0x12a   :  { %v597_v27 = vpop.f32.mrf.mxu0 }
 0x12b   :  { %v845_v28 = vadd.f32 %v844_v26, %v676_v25  ;;  %v598_v29 = vadd.f32 %v1477_v48, %v597_v27  ;;  %v766_v30 = vpop.f32.mrf.mxu1 }
 0x12d   :  { %933 = vst.msk [vmem:[%s1802_s3 + $0x180] sm:$0xff] %vm884_vm0, %v845_v28  ;;  %v767_v31 = vadd.f32 %v766_v30, %v598_v29 }
 0x12f   :  { %902 = vst.msk [vmem:[%s1802_s3 + $0x88] sm:$0xff] %vm884_vm0, %v767_v31 }
 0x130   :  { %v677_v32 = vpop.f32.mrf.mxu2 }
 0x131   :  { %v678_v33 = vadd.f32 %v1477_v48, %v677_v32  ;;  %v846_v34 = vpop.f32.mrf.mxu3 }
 0x132   :  { %v600_v35 = vpop.f32.mrf.mxu0 }
 0x133   :  { %v847_v36 = vadd.f32 %v846_v34, %v678_v33  ;;  %v601_v37 = vadd.f32 %v1477_v48, %v600_v35  ;;  %v769_v38 = vpop.f32.mrf.mxu1 }
 0x135   :  { %934 = vst.msk [vmem:[%s1802_s3 + $0x188] sm:$0xff] %vm884_vm0, %v847_v36  ;;  %v770_v39 = vadd.f32 %v769_v38, %v601_v37 }
 0x137   :  { %903 = vst.msk [vmem:[%s1802_s3 + $0x90] sm:$0xff] %vm884_vm0, %v770_v39 }
 0x138   :  { %v680_v40 = vpop.f32.mrf.mxu2 }
 0x139   :  { %v681_v41 = vadd.f32 %v1477_v48, %v680_v40  ;;  %v849_v42 = vpop.f32.mrf.mxu3 }
 0x13a   :  { %v602_v43 = vpop.f32.mrf.mxu0 }
 0x13b   :  { %v850_v44 = vadd.f32 %v849_v42, %v681_v41  ;;  %v603_v45 = vadd.f32 %v1477_v48, %v602_v43  ;;  %v771_v46 = vpop.f32.mrf.mxu1 }
 0x13d   :  { %935 = vst.msk [vmem:[%s1802_s3 + $0x190] sm:$0xff] %vm884_vm0, %v850_v44  ;;  %v772_v47 = vadd.f32 %v771_v46, %v603_v45 }
 0x13f   :  { %904 = vst.msk [vmem:[%s1802_s3 + $0x98] sm:$0xff] %vm884_vm0, %v772_v47 }
 0x140   :  { %v682_v49 = vpop.f32.mrf.mxu2 }
 0x141   :  { %v683_v50 = vadd.f32 %v1477_v48, %v682_v49  ;;  %v851_v51 = vpop.f32.mrf.mxu3 }
 0x142   :  { %v605_v52 = vpop.f32.mrf.mxu0 }
 0x143   :  { %v852_v53 = vadd.f32 %v851_v51, %v683_v50  ;;  %v606_v54 = vadd.f32 %v1477_v48, %v605_v52  ;;  %v774_v55 = vpop.f32.mrf.mxu1 }
 0x145   :  { %936 = vst.msk [vmem:[%s1802_s3 + $0x198] sm:$0xff] %vm884_vm0, %v852_v53  ;;  %v775_v56 = vadd.f32 %v774_v55, %v606_v54 }
 0x147   :  { %905 = vst.msk [vmem:[%s1802_s3 + $0xa0] sm:$0xff] %vm884_vm0, %v775_v56 }
 0x148   :  { %v685_v57 = vpop.f32.mrf.mxu2 }
 0x149   :  { %v686_v58 = vadd.f32 %v1477_v48, %v685_v57  ;;  %v854_v59 = vpop.f32.mrf.mxu3 }
 0x14a   :  { %v607_v60 = vpop.f32.mrf.mxu0 }
 0x14b   :  { %v855_v61 = vadd.f32 %v854_v59, %v686_v58  ;;  %v608_v62 = vadd.f32 %v1477_v48, %v607_v60  ;;  %v776_v63 = vpop.f32.mrf.mxu1 }
 0x14d   :  { %937 = vst.msk [vmem:[%s1802_s3 + $0x1a0] sm:$0xff] %vm884_vm0, %v855_v61  ;;  %v777_v0 = vadd.f32 %v776_v63, %v608_v62 }
 0x14f   :  { %906 = vst.msk [vmem:[%s1802_s3 + $0xa8] sm:$0xff] %vm884_vm0, %v777_v0 }
 0x150   :  { %v687_v1 = vpop.f32.mrf.mxu2 }
 0x151   :  { %v688_v2 = vadd.f32 %v1477_v48, %v687_v1  ;;  %v856_v3 = vpop.f32.mrf.mxu3 }
 0x152   :  { %v610_v4 = vpop.f32.mrf.mxu0 }
 0x153   :  { %v857_v5 = vadd.f32 %v856_v3, %v688_v2  ;;  %v611_v6 = vadd.f32 %v1477_v48, %v610_v4  ;;  %v779_v7 = vpop.f32.mrf.mxu1 }
 0x155   :  { %938 = vst.msk [vmem:[%s1802_s3 + $0x1a8] sm:$0xff] %vm884_vm0, %v857_v5  ;;  %v780_v8 = vadd.f32 %v779_v7, %v611_v6 }
 0x157   :  { %907 = vst.msk [vmem:[%s1802_s3 + $0xb0] sm:$0xff] %vm884_vm0, %v780_v8 }
 0x158   :  { %v690_v9 = vpop.f32.mrf.mxu2 }
 0x159   :  { %v691_v10 = vadd.f32 %v1477_v48, %v690_v9  ;;  %v859_v11 = vpop.f32.mrf.mxu3 }
 0x15a   :  { %v612_v12 = vpop.f32.mrf.mxu0 }
 0x15b   :  { %v860_v13 = vadd.f32 %v859_v11, %v691_v10  ;;  %v613_v14 = vadd.f32 %v1477_v48, %v612_v12  ;;  %v781_v15 = vpop.f32.mrf.mxu1 }
 0x15d   :  { %939 = vst.msk [vmem:[%s1802_s3 + $0x1b0] sm:$0xff] %vm884_vm0, %v860_v13  ;;  %v782_v16 = vadd.f32 %v781_v15, %v613_v14 }
 0x15f   :  { %908 = vst.msk [vmem:[%s1802_s3 + $0xb8] sm:$0xff] %vm884_vm0, %v782_v16 }
 0x160   :  { %v692_v17 = vpop.f32.mrf.mxu2 }
 0x161   :  { %v693_v18 = vadd.f32 %v1477_v48, %v692_v17  ;;  %v861_v19 = vpop.f32.mrf.mxu3 }
 0x162   :  { %v615_v20 = vpop.f32.mrf.mxu0 }
 0x163   :  { %v862_v21 = vadd.f32 %v861_v19, %v693_v18  ;;  %v616_v22 = vadd.f32 %v1477_v48, %v615_v20  ;;  %v784_v23 = vpop.f32.mrf.mxu1 }
 0x165   :  { %940 = vst.msk [vmem:[%s1802_s3 + $0x1b8] sm:$0xff] %vm884_vm0, %v862_v21  ;;  %v785_v24 = vadd.f32 %v784_v23, %v616_v22 }
 0x167   :  { %909 = vst.msk [vmem:[%s1802_s3 + $0xc0] sm:$0xff] %vm884_vm0, %v785_v24 }
 0x168   :  { %v695_v25 = vpop.f32.mrf.mxu2 }
 0x169   :  { %v696_v26 = vadd.f32 %v1477_v48, %v695_v25  ;;  %v864_v27 = vpop.f32.mrf.mxu3 }
 0x16a   :  { %v617_v28 = vpop.f32.mrf.mxu0 }
 0x16b   :  { %v865_v29 = vadd.f32 %v864_v27, %v696_v26  ;;  %v618_v30 = vadd.f32 %v1477_v48, %v617_v28  ;;  %v786_v31 = vpop.f32.mrf.mxu1 }
 0x16d   :  { %941 = vst.msk [vmem:[%s1802_s3 + $0x1c0] sm:$0xff] %vm884_vm0, %v865_v29  ;;  %v787_v32 = vadd.f32 %v786_v31, %v618_v30 }
 0x16f   :  { %910 = vst.msk [vmem:[%s1802_s3 + $0xc8] sm:$0xff] %vm884_vm0, %v787_v32 }
 0x170   :  { %v697_v33 = vpop.f32.mrf.mxu2 }
 0x171   :  { %v698_v34 = vadd.f32 %v1477_v48, %v697_v33  ;;  %v866_v35 = vpop.f32.mrf.mxu3 }
 0x172   :  { %v620_v36 = vpop.f32.mrf.mxu0 }
 0x173   :  { %v867_v37 = vadd.f32 %v866_v35, %v698_v34  ;;  %v621_v38 = vadd.f32 %v1477_v48, %v620_v36  ;;  %v789_v39 = vpop.f32.mrf.mxu1 }
 0x175   :  { %942 = vst.msk [vmem:[%s1802_s3 + $0x1c8] sm:$0xff] %vm884_vm0, %v867_v37  ;;  %v790_v40 = vadd.f32 %v789_v39, %v621_v38 }
 0x177   :  { %911 = vst.msk [vmem:[%s1802_s3 + $0xd0] sm:$0xff] %vm884_vm0, %v790_v40 }
 0x178   :  { %v700_v41 = vpop.f32.mrf.mxu2 }
 0x179   :  { %v701_v42 = vadd.f32 %v1477_v48, %v700_v41  ;;  %v869_v43 = vpop.f32.mrf.mxu3 }
 0x17a   :  { %v622_v44 = vpop.f32.mrf.mxu0 }
 0x17b   :  { %v870_v45 = vadd.f32 %v869_v43, %v701_v42  ;;  %v623_v46 = vadd.f32 %v1477_v48, %v622_v44  ;;  %v791_v47 = vpop.f32.mrf.mxu1 }
 0x17d   :  { %943 = vst.msk [vmem:[%s1802_s3 + $0x1d0] sm:$0xff] %vm884_vm0, %v870_v45  ;;  %v792_v49 = vadd.f32 %v791_v47, %v623_v46 }
 0x17f   :  { %912 = vst.msk [vmem:[%s1802_s3 + $0xd8] sm:$0xff] %vm884_vm0, %v792_v49 }
 0x180   :  { %v702_v50 = vpop.f32.mrf.mxu2 }
 0x181   :  { %v703_v51 = vadd.f32 %v1477_v48, %v702_v50  ;;  %v871_v52 = vpop.f32.mrf.mxu3 }
 0x182   :  { %v625_v53 = vpop.f32.mrf.mxu0 }
 0x183   :  { %v872_v54 = vadd.f32 %v871_v52, %v703_v51  ;;  %v626_v55 = vadd.f32 %v1477_v48, %v625_v53  ;;  %v794_v56 = vpop.f32.mrf.mxu1 }
 0x185   :  { %944 = vst.msk [vmem:[%s1802_s3 + $0x1d8] sm:$0xff] %vm884_vm0, %v872_v54  ;;  %v795_v57 = vadd.f32 %v794_v56, %v626_v55 }
 0x187   :  { %913 = vst.msk [vmem:[%s1802_s3 + $0xe0] sm:$0xff] %vm884_vm0, %v795_v57 }
 0x188   :  { %v705_v58 = vpop.f32.mrf.mxu2 }
 0x189   :  { %v706_v59 = vadd.f32 %v1477_v48, %v705_v58  ;;  %v874_v60 = vpop.f32.mrf.mxu3 }
 0x18a   :  { %v627_v61 = vpop.f32.mrf.mxu0 }
 0x18b   :  { %v875_v62 = vadd.f32 %v874_v60, %v706_v59  ;;  %v628_v63 = vadd.f32 %v1477_v48, %v627_v61  ;;  %v796_v0 = vpop.f32.mrf.mxu1 }
 0x18d   :  { %945 = vst.msk [vmem:[%s1802_s3 + $0x1e0] sm:$0xff] %vm884_vm0, %v875_v62  ;;  %v797_v1 = vadd.f32 %v796_v0, %v628_v63 }
 0x18f   :  { %914 = vst.msk [vmem:[%s1802_s3 + $0xe8] sm:$0xff] %vm884_vm0, %v797_v1 }
 0x190   :  { %v707_v2 = vpop.f32.mrf.mxu2 }
 0x191   :  { %v708_v3 = vadd.f32 %v1477_v48, %v707_v2  ;;  %v876_v4 = vpop.f32.mrf.mxu3 }
 0x192   :  { %v630_v5 = vpop.f32.mrf.mxu0 }
 0x193   :  { %v877_v6 = vadd.f32 %v876_v4, %v708_v3  ;;  %v631_v7 = vadd.f32 %v1477_v48, %v630_v5  ;;  %v799_v8 = vpop.f32.mrf.mxu1 }
 0x195   :  { %946 = vst.msk [vmem:[%s1802_s3 + $0x1e8] sm:$0xff] %vm884_vm0, %v877_v6  ;;  %v800_v9 = vadd.f32 %v799_v8, %v631_v7 }
 0x197   :  { %915 = vst.msk [vmem:[%s1802_s3 + $0xf0] sm:$0xff] %vm884_vm0, %v800_v9 }
 0x198   :  { %v710_v10 = vpop.f32.mrf.mxu2 }
 0x199   :  { %v711_v11 = vadd.f32 %v1477_v48, %v710_v10  ;;  %v879_v12 = vpop.f32.mrf.mxu3 }
 0x19a   :  { %v632_v13 = vpop.f32.mrf.mxu0 }
 0x19b   :  { %v880_v14 = vadd.f32 %v879_v12, %v711_v11  ;;  %v633_v15 = vadd.f32 %v1477_v48, %v632_v13  ;;  %v801_v16 = vpop.f32.mrf.mxu1 }
 0x19d   :  { %947 = vst.msk [vmem:[%s1802_s3 + $0x1f0] sm:$0xff] %vm884_vm0, %v880_v14  ;;  %v802_v17 = vadd.f32 %v801_v16, %v633_v15 }
 0x19f   :  { %916 = vst.msk [vmem:[%s1802_s3 + $0xf8] sm:$0xff] %vm884_vm0, %v802_v17 }
 0x1a0   :  { %v712_v18 = vpop.f32.mrf.mxu2 }
 0x1a1   :  { %v713_v19 = vadd.f32 %v1477_v48, %v712_v18  ;;  %v881_v20 = vpop.f32.mrf.mxu3 }
 0x1a3   :  { %v882_v21 = vadd.f32 %v881_v20, %v713_v19 }
 0x1a5   :  { %948 = vst.msk [vmem:[%s1802_s3 + $0x1f8] sm:$0xff] %vm884_vm0, %v882_v21 }
 0x1a6   :  { %953 = vsyncpa [#allocation3], 1 }

</bundles_post_ra>
